<compile_context>
chip_gen: v7x
topology: tpu7x:2x2x1
jax: 0.10.0
libtpu: 0.0.40
codegen_flags: <defaults>
</compile_context>

<pallas_src>
import functools

import jax
import jax.numpy as jnp
from jax.experimental import pallas as pl
from jax.experimental.pallas import tpu as pltpu


def _round_up(x, m):
    return ((x + m - 1) // m) * m


# --------------------------------------------------------------------------
# Kernel: whole MLP on one batch tile, all weights resident in VMEM.
# --------------------------------------------------------------------------
def _fused_mlp_kernel(*refs, num_layers, num_hidden):
    """refs = (x_ref, w0, b0, w1, b1, ..., w_{L-1}, b_{L-1}, o_ref)

    x_ref : (tm, K0p)      bf16  zero-padded input activations
    w_l   : (Kp_l, Np_l)   bf16  per-layer padded, BN-folded weights
    b_l   : (1, Np_l)      f32   per-layer padded, BN-folded bias
    o_ref : (tm, NLp)      f32   output (valid lanes = [:out_features])
    """
    x_ref, o_ref = refs[0], refs[-1]
    h = x_ref[...]                                    # (tm, K0p) bf16
    y = None
    for l in range(num_layers):                       # static unroll (few layers)
        w_ref = refs[1 + 2 * l]
        b_ref = refs[2 + 2 * l]
        # MXU: bf16 x bf16 -> f32 accumulate.
        y = jnp.dot(h, w_ref[...], preferred_element_type=jnp.float32)
        y = y + b_ref[...]                            # bias (BN already folded)
        if l < num_hidden:
            y = jnp.maximum(y, 0.0)                   # ReLU; Dropout(eval) = id
            h = y.astype(jnp.bfloat16)                # next layer's MXU operand
    o_ref[...] = y.astype(o_ref.dtype)


# --------------------------------------------------------------------------
# Wrapper (jitted so the pad/cast fuses with the pallas_call).
# --------------------------------------------------------------------------
@functools.partial(jax.jit, static_argnames=("num_hidden", "out_features"))
def mlp_forward(x, ws_pad, bs_pad, *, num_hidden, out_features):
    B, F = x.shape
    L = len(ws_pad)
    assert num_hidden == L - 1, "num_hidden must equal number of hidden layers"

    k0_pad = ws_pad[0].shape[0]
    n_last_pad = ws_pad[-1].shape[1]
    assert F <= k0_pad

    # Batch tile: 16-row aligned (bf16 sublane packing), capped at 256 rows.
    tm = min(_round_up(max(B, 16), 16), 256)
    B_pad = _round_up(B, tm)

    # ---- VMEM budget (weights resident; BlockSpec double-buffers everything).
    w_bytes = sum(int(w.size) * 2 for w in ws_pad)               # bf16
    b_bytes = sum(8 * int(b.shape[1]) * 4 for b in bs_pad)       # (1,N)->(8,N) f32
    x_tile = tm * k0_pad * 2
    o_tile = tm * n_last_pad * 4
    vmem_needed = 2 * (w_bytes + b_bytes + x_tile + o_tile)
    # Conservative across generations (v7x: 64 MiB physical / 32 MiB scoped).
    assert vmem_needed < 24 * 1024 * 1024, (
        "layer widths / batch tile too large for the fully-fused resident-weight "
        "kernel; use a tiled (tm, tn, tk) matmul grid instead")
    vmem_limit = int(min(max(2 * vmem_needed, 4 * 1024 * 1024), 32 * 1024 * 1024))

    # Pad + cast the input under the same jit (fuses with the kernel launch).
    x_pad = jnp.zeros((B_pad, k0_pad), jnp.bfloat16)
    x_pad = x_pad.at[:B, :F].set(x.astype(jnp.bfloat16))

    operands = [x_pad]
    in_specs = [pl.BlockSpec((tm, k0_pad), lambda i: (i, 0))]     # x: batch-tiled
    for w, b in zip(ws_pad, bs_pad):
        kp, np_ = w.shape
        operands += [w, b]
        in_specs += [
            pl.BlockSpec((kp, np_), lambda i: (0, 0)),            # weight: resident
            pl.BlockSpec((1, np_), lambda i: (0, 0)),             # bias: resident
        ]

    out = pl.pallas_call(
        functools.partial(_fused_mlp_kernel, num_layers=L, num_hidden=num_hidden),
        out_shape=jax.ShapeDtypeStruct((B_pad, n_last_pad), jnp.float32),
        grid=(B_pad // tm,),
        in_specs=in_specs,
        out_specs=pl.BlockSpec((tm, n_last_pad), lambda i: (i, 0)),
        compiler_params=pltpu.CompilerParams(
            dimension_semantics=("parallel",),                    # megacore on v7x
            vmem_limit_bytes=vmem_limit),
    )(*operands)

    return out[:B, :out_features]


# --------------------------------------------------------------------------
# Parameter construction (PyTorch-shaped synthetic params) and packing.
# --------------------------------------------------------------------------
def init_params(key, input_size, hidden_sizes, output_size, eps=1e-5):
    """Synthetic Linear + BatchNorm1d(eval) parameters (non-trivial BN stats)."""
    params = []
    prev = input_size
    sizes = list(hidden_sizes) + [output_size]
    for idx, h in enumerate(sizes):
        key, kw, kb, ks = jax.random.split(key, 4)
        bound = 1.0 / float(prev) ** 0.5
        w = jax.random.uniform(kw, (prev, h), jnp.float32, -bound, bound)
        b = jax.random.uniform(kb, (h,), jnp.float32, -bound, bound)
        is_hidden = idx < len(hidden_sizes)
        if is_hidden:
            k1, k2, k3, k4 = jax.random.split(ks, 4)
            gamma = jax.random.uniform(k1, (h,), jnp.float32, 0.5, 1.5)
            beta = jax.random.uniform(k2, (h,), jnp.float32, -0.5, 0.5)
            r_mean = jax.random.uniform(k3, (h,), jnp.float32, -0.5, 0.5)
            r_var = jax.random.uniform(k4, (h,), jnp.float32, 0.5, 1.5)
            scale = gamma / jnp.sqrt(r_var + eps)
            shift = beta - r_mean * scale
        else:
            gamma = beta = r_mean = r_var = None
            scale = jnp.ones((h,), jnp.float32)
            shift = jnp.zeros((h,), jnp.float32)
        params.append(dict(w=w, b=b, gamma=gamma, beta=beta,
                           running_mean=r_mean, running_var=r_var,
                           scale=scale, shift=shift, hidden=is_hidden))
        prev = h
    return params


def fold_and_pack_params(params):
    """Fold hidden-layer BN affines into the next layer; pad per-layer to 128s.

    Padded rows/cols stay exactly zero, so padded lanes stay zero through the
    whole network (bias padding = 0, ReLU(0) = 0, zero weight rows/cols).
    """
    L = len(params)
    ws = [jnp.asarray(p["w"], jnp.float32) for p in params]
    bs = [jnp.asarray(p["b"], jnp.float32) for p in params]
    for l in range(L - 1):
        if params[l]["hidden"]:
            scale = params[l]["scale"]
            shift = params[l]["shift"]
            w_next = ws[l + 1]
            bs[l + 1] = bs[l + 1] + shift @ w_next        # uses ORIGINAL W_{l+1}
            ws[l + 1] = scale[:, None] * w_next
    ws_pad, bs_pad = [], []
    for w, b in zip(ws, bs):
        K, N = w.shape
        Kp, Np = _round_up(K, 128), _round_up(N, 128)
        wp = jnp.zeros((Kp, Np), jnp.float32).at[:K, :N].set(w).astype(jnp.bfloat16)
        bp = jnp.zeros((1, Np), jnp.float32).at[0, :N].set(b)
        ws_pad.append(wp)
        bs_pad.append(bp)
    return tuple(ws_pad), tuple(bs_pad)


# --------------------------------------------------------------------------
# References.
# --------------------------------------------------------------------------
def mlp_module_ref(x, params, eps=1e-5):
    """Pure-f32 reference of the original module (eval mode)."""
    h = x
    y = None
    for p in params:
        y = h @ p["w"] + p["b"]
        if p["hidden"]:
            y = jnp.maximum(y, 0.0)
            y = (y - p["running_mean"]) / jnp.sqrt(p["running_var"] + eps)
            y = y * p["gamma"] + p["beta"]
            # Dropout in eval mode is identity.
        h = y
    return y


def mlp_folded_ref(x, ws_pad, bs_pad, num_hidden, out_features):
    """Reference that mirrors the kernel's folded bf16-operand / f32-acc math."""
    B, F = x.shape
    k0_pad = ws_pad[0].shape[0]
    h = jnp.zeros((B, k0_pad), jnp.bfloat16).at[:, :F].set(x.astype(jnp.bfloat16))
    y = None
    for l, (w, b) in enumerate(zip(ws_pad, bs_pad)):
        y = jnp.dot(h, w, preferred_element_type=jnp.float32) + b
        if l < num_hidden:
            y = jnp.maximum(y, 0.0)
            h = y.astype(jnp.bfloat16)
    return y[:, :out_features]


if __name__ == "__main__":
    # TODO(synk): training-mode BatchNorm (batch-statistics update) and Dropout
    # random masking are not implemented; this is the eval-mode forward pass.
    input_size = 32
    hidden_sizes = [64, 32]
    output_size = 16
    batch = 8

    key = jax.random.PRNGKey(0)
    key, kx = jax.random.split(key)
    x = jax.random.normal(kx, (batch, input_size), jnp.float32)

    params = init_params(key, input_size, hidden_sizes, output_size)
    ws_pad, bs_pad = fold_and_pack_params(params)

    out = mlp_forward(x, ws_pad, bs_pad,
                      num_hidden=len(hidden_sizes),
                      out_features=output_size)
    out = jax.block_until_ready(out)

    ref_exact = mlp_folded_ref(x, ws_pad, bs_pad, len(hidden_sizes), output_size)
    ref_module = mlp_module_ref(x, params)

    assert out.shape == (batch, output_size)
    # Tight check against the bit-matched (folded, bf16-operand) reference.
    assert jnp.allclose(out, ref_exact, atol=1e-3, rtol=1e-3), \
        float(jnp.max(jnp.abs(out - ref_exact)))
    # Looser check against the true f32 module semantics (bf16 MXU operands).
    assert jnp.allclose(out, ref_module, atol=5e-2, rtol=5e-2), \
        float(jnp.max(jnp.abs(out - ref_module)))

    print("KERNEL_OK")
</pallas_src>

<mosaic_0001>
module attributes {stable_mosaic.version = 11 : i64} {
  func.func @_fused_mlp_kernel(%arg0: i32, %arg1: memref<16x128xbf16, #tpu.memory_space<vmem>>, %arg2: memref<128x128xbf16, #tpu.memory_space<vmem>>, %arg3: memref<1x128xf32, #tpu.memory_space<vmem>>, %arg4: memref<128x128xbf16, #tpu.memory_space<vmem>>, %arg5: memref<1x128xf32, #tpu.memory_space<vmem>>, %arg6: memref<128x128xbf16, #tpu.memory_space<vmem>>, %arg7: memref<1x128xf32, #tpu.memory_space<vmem>>, %arg8: memref<16x128xf32, #tpu.memory_space<vmem>>) attributes {dimension_semantics = [#tpu.dimension_semantics<parallel>], iteration_bounds = array<i64: 1>, scalar_prefetch = 0 : i64, scratch_operands = 0 : i64, tpu.core_type = #tpu.core_type<tc>, window_params = [{transform_indices = @transform_0, window_bounds = array<i64: 16, 128>}, {pipeline_mode = #tpu.pipeline_mode<synchronous>, transform_indices = @transform_1, window_bounds = array<i64: 128, 128>}, {pipeline_mode = #tpu.pipeline_mode<synchronous>, transform_indices = @transform_2, window_bounds = array<i64: 1, 128>}, {pipeline_mode = #tpu.pipeline_mode<synchronous>, transform_indices = @transform_3, window_bounds = array<i64: 128, 128>}, {pipeline_mode = #tpu.pipeline_mode<synchronous>, transform_indices = @transform_4, window_bounds = array<i64: 1, 128>}, {pipeline_mode = #tpu.pipeline_mode<synchronous>, transform_indices = @transform_5, window_bounds = array<i64: 128, 128>}, {pipeline_mode = #tpu.pipeline_mode<synchronous>, transform_indices = @transform_6, window_bounds = array<i64: 1, 128>}, {transform_indices = @transform_7, window_bounds = array<i64: 16, 128>}]} {
    %c0 = arith.constant 0 : index
    %c0_0 = arith.constant 0 : index
    %0 = vector.load %arg1[%c0, %c0_0] : memref<16x128xbf16, #tpu.memory_space<vmem>>, vector<16x128xbf16>
    %c0_1 = arith.constant 0 : index
    %c0_2 = arith.constant 0 : index
    %1 = vector.load %arg2[%c0_1, %c0_2] : memref<128x128xbf16, #tpu.memory_space<vmem>>, vector<128x128xbf16>
    %cst = arith.constant dense<0.000000e+00> : vector<16x128xf32>
    %2 = tpu.matmul %0, %1, %cst {dimension_numbers = #tpu.dot_dimension_numbers<[1], [0], [0], [1], [0, 0, 1, 1], [], []>} : vector<16x128xbf16>, vector<128x128xbf16>, vector<16x128xf32> -> vector<16x128xf32>
    %c0_3 = arith.constant 0 : index
    %c0_4 = arith.constant 0 : index
    %3 = vector.load %arg3[%c0_3, %c0_4] : memref<1x128xf32, #tpu.memory_space<vmem>>, vector<1x128xf32>
    %4 = vector.broadcast %3 : vector<1x128xf32> to vector<16x128xf32>
    %5 = arith.addf %2, %4 : vector<16x128xf32>
    %cst_5 = arith.constant 0.000000e+00 : f32
    %6 = vector.broadcast %cst_5 : f32 to vector<16x128xf32>
    %7 = arith.maximumf %5, %6 : vector<16x128xf32>
    %8 = arith.truncf %7 : vector<16x128xf32> to vector<16x128xbf16>
    %c0_6 = arith.constant 0 : index
    %c0_7 = arith.constant 0 : index
    %9 = vector.load %arg4[%c0_6, %c0_7] : memref<128x128xbf16, #tpu.memory_space<vmem>>, vector<128x128xbf16>
    %cst_8 = arith.constant dense<0.000000e+00> : vector<16x128xf32>
    %10 = tpu.matmul %8, %9, %cst_8 {dimension_numbers = #tpu.dot_dimension_numbers<[1], [0], [0], [1], [0, 0, 1, 1], [], []>} : vector<16x128xbf16>, vector<128x128xbf16>, vector<16x128xf32> -> vector<16x128xf32>
    %c0_9 = arith.constant 0 : index
    %c0_10 = arith.constant 0 : index
    %11 = vector.load %arg5[%c0_9, %c0_10] : memref<1x128xf32, #tpu.memory_space<vmem>>, vector<1x128xf32>
    %12 = vector.broadcast %11 : vector<1x128xf32> to vector<16x128xf32>
    %13 = arith.addf %10, %12 : vector<16x128xf32>
    %cst_11 = arith.constant 0.000000e+00 : f32
    %14 = vector.broadcast %cst_11 : f32 to vector<16x128xf32>
    %15 = arith.maximumf %13, %14 : vector<16x128xf32>
    %16 = arith.truncf %15 : vector<16x128xf32> to vector<16x128xbf16>
    %c0_12 = arith.constant 0 : index
    %c0_13 = arith.constant 0 : index
    %17 = vector.load %arg6[%c0_12, %c0_13] : memref<128x128xbf16, #tpu.memory_space<vmem>>, vector<128x128xbf16>
    %cst_14 = arith.constant dense<0.000000e+00> : vector<16x128xf32>
    %18 = tpu.matmul %16, %17, %cst_14 {dimension_numbers = #tpu.dot_dimension_numbers<[1], [0], [0], [1], [0, 0, 1, 1], [], []>} : vector<16x128xbf16>, vector<128x128xbf16>, vector<16x128xf32> -> vector<16x128xf32>
    %c0_15 = arith.constant 0 : index
    %c0_16 = arith.constant 0 : index
    %19 = vector.load %arg7[%c0_15, %c0_16] : memref<1x128xf32, #tpu.memory_space<vmem>>, vector<1x128xf32>
    %20 = vector.broadcast %19 : vector<1x128xf32> to vector<16x128xf32>
    %21 = arith.addf %18, %20 : vector<16x128xf32>
    %c0_17 = arith.constant 0 : index
    %c0_18 = arith.constant 0 : index
    %22 = vector.load %arg8[%c0_17, %c0_18] : memref<16x128xf32, #tpu.memory_space<vmem>>, vector<16x128xf32>
    tpu.vector_store %arg8[%c0_17, %c0_18], %21 {strides = array<i32>} : memref<16x128xf32, #tpu.memory_space<vmem>>, vector<16x128xf32>,
    return
  }
  func.func @transform_0(%arg0: i32) -> (i32, i32) {
    %c0_i32 = arith.constant 0 : i32
    %c0_i32_0 = arith.constant 0 : i32
    return %arg0, %c0_i32 : i32, i32
  }
  func.func @transform_1(%arg0: i32) -> (i32, i32) {
    %c0_i32 = arith.constant 0 : i32
    %c0_i32_0 = arith.constant 0 : i32
    %c0_i32_1 = arith.constant 0 : i32
    return %c0_i32, %c0_i32_0 : i32, i32
  }
  func.func @transform_2(%arg0: i32) -> (i32, i32) {
    %c0_i32 = arith.constant 0 : i32
    %c0_i32_0 = arith.constant 0 : i32
    %c0_i32_1 = arith.constant 0 : i32
    return %c0_i32, %c0_i32_0 : i32, i32
  }
  func.func @transform_3(%arg0: i32) -> (i32, i32) {
    %c0_i32 = arith.constant 0 : i32
    %c0_i32_0 = arith.constant 0 : i32
    %c0_i32_1 = arith.constant 0 : i32
    return %c0_i32, %c0_i32_0 : i32, i32
  }
  func.func @transform_4(%arg0: i32) -> (i32, i32) {
    %c0_i32 = arith.constant 0 : i32
    %c0_i32_0 = arith.constant 0 : i32
    %c0_i32_1 = arith.constant 0 : i32
    return %c0_i32, %c0_i32_0 : i32, i32
  }
  func.func @transform_5(%arg0: i32) -> (i32, i32) {
    %c0_i32 = arith.constant 0 : i32
    %c0_i32_0 = arith.constant 0 : i32
    %c0_i32_1 = arith.constant 0 : i32
    return %c0_i32, %c0_i32_0 : i32, i32
  }
  func.func @transform_6(%arg0: i32) -> (i32, i32) {
    %c0_i32 = arith.constant 0 : i32
    %c0_i32_0 = arith.constant 0 : i32
    %c0_i32_1 = arith.constant 0 : i32
    return %c0_i32, %c0_i32_0 : i32, i32
  }
  func.func @transform_7(%arg0: i32) -> (i32, i32) {
    %c0_i32 = arith.constant 0 : i32
    %c0_i32_0 = arith.constant 0 : i32
    return %arg0, %c0_i32 : i32, i32
  }
}

</mosaic_0001>

<bundles_post_ra>
// kernel: mlp_forward.1
= control target key start
LH: loop header
LB: loop body
LE: loop exit
PB: predicated region body
PF: predicated region fallthrough
CT: control target
= control target key end

     0   :  { %12 = vsyncpa [#allocation3], 0  ;;  %s790_s0 = inlined_call_operand.vmem [shape: bf16[16,128], index: 0, kind: input, shape index: {}]   ;;  %s791_s1 = inlined_call_operand.hbm [shape: bf16[128,128], index: 1, kind: input, shape index: {}]   ;;  %s792_s2 = inlined_call_operand.vmem [shape: f32[1,128], index: 2, kind: input, shape index: {}]   ;;  %s793_s3 = inlined_call_operand.hbm [shape: bf16[128,128], index: 3, kind: input, shape index: {}]   ;;  %s794_s4 = inlined_call_operand.vmem [shape: f32[1,128], index: 4, kind: input, shape index: {}]   ;;  %s795_s5 = inlined_call_operand.hbm [shape: bf16[128,128], index: 5, kind: input, shape index: {}]   ;;  %s796_s6 = inlined_call_operand.vmem [shape: f32[1,128], index: 6, kind: input, shape index: {}]   ;;  %s797_s7 = inlined_call_operand.vmem [shape: f32[16,128], index: 7, kind: output, shape index: {}]  }
   0x1   :  { %13 = vsyncpa [#allocation5], 0  ;;  %s643_s24 = smov [#allocation4]   ;;  %s644_s26 = smov [#allocation2]  }
   0x2   :  { %s35_s25 = sshll.u32 %s643_s24, 4  ;;  %s21_s27 = sshll.u32 %s644_s26, 4  ;;  %s36_s25 = int_to_ptr.vmem [resolvable:$true] %s35_s25  ;;  %s690_s27 = int_to_ptr.vmem [resolvable:$true] %s21_s27 }
   0x3   :  { %s573_s30 = scalar_lea.hbm %s793_s3, 1024 }
   0x4   :  { %p574_p0 = scmp.ne.s32.totalorder %s793_s3, %s573_s30  ;;  %p577_p1 = scmp.lt.u32.totalorder %s573_s30, %s793_s3 }
   0x6   :  { %p579_p2 = pnand %p577_p1, %p574_p0 }
   0x8   :  { %582 = shalt.err (!%p579_p2)
}
   0x9   :  { %s583_s12 = scalar_lea.vmem %s36_s25, 1024  ;;  %p588_p4 = scmp.lt.s32.totalorder %s36_s25, %s36_s25 }
   0xa   :  { %p584_p3 = scmp.ne.s32.totalorder %s36_s25, %s583_s12  ;;  %p589_p5 = scmp.lt.s32.totalorder %s583_s12, %s583_s12 }
   0xc   :  { %p590_p6 = por %p589_p5, %p588_p4 }
   0xe   :  { %p591_p7 = pnand %p590_p6, %p584_p3 }
  0x10   :  { %594 = shalt.err (!%p591_p7)
}
  0x11   :  { %s645_s13 = smov 64   ;;  %s646_s14 = smov 4  }
  0x12   :  { %41 = dma.hbm_to_vmem [thread:$0]  %s793_s3, 1024, %s36_s25, [#allocation5], %s645_s13, %s645_s13, %s646_s14  }
  0x13   :  { %s595_s19 = scalar_lea.hbm %s791_s1, 1024 }
  0x14   :  { %p596_p8 = scmp.ne.s32.totalorder %s791_s1, %s595_s19  ;;  %p599_p9 = scmp.lt.u32.totalorder %s595_s19, %s791_s1 }
  0x16   :  { %p601_p10 = pnand %p599_p9, %p596_p8 }
  0x18   :  { %604 = shalt.err (!%p601_p10)
}
  0x19   :  { %s605_s24 = scalar_lea.vmem %s690_s27, 1024  ;;  %p610_p12 = scmp.lt.s32.totalorder %s690_s27, %s690_s27 }
  0x1a   :  { %p606_p11 = scmp.ne.s32.totalorder %s690_s27, %s605_s24  ;;  %p611_p13 = scmp.lt.s32.totalorder %s605_s24, %s605_s24 }
  0x1c   :  { %p612_p0 = por %p611_p13, %p610_p12 }
  0x1e   :  { %p613_p1 = pnand %p612_p0, %p606_p11 }
  0x20   :  { %616 = shalt.err (!%p613_p1)
}
  0x21   :  { %27 = dma.hbm_to_vmem [thread:$0]  %s791_s1, 1024, %s690_s27, [#allocation3], %s645_s13, %s645_s13, %s646_s14  }
  0x22   :  { %s647_s26 = smov [#allocation6]   ;;  %s617_s8 = scalar_lea.hbm %s795_s5, 1024 }
  0x23   :  { %s49_s28 = sshll.u32 %s647_s26, 4  ;;  %p618_p2 = scmp.ne.s32.totalorder %s795_s5, %s617_s8  ;;  %s50_s28 = int_to_ptr.vmem [resolvable:$true] %s49_s28 }
  0x24   :  { %p621_p3 = scmp.lt.u32.totalorder %s617_s8, %s795_s5 }
  0x26   :  { %p623_p4 = pnand %p621_p3, %p618_p2 }
  0x28   :  { %626 = shalt.err (!%p623_p4)
}
  0x29   :  { %s627_s15 = scalar_lea.vmem %s50_s28, 1024  ;;  %p632_p6 = scmp.lt.s32.totalorder %s50_s28, %s50_s28 }
  0x2a   :  { %p628_p5 = scmp.ne.s32.totalorder %s50_s28, %s627_s15  ;;  %p633_p7 = scmp.lt.s32.totalorder %s627_s15, %s627_s15 }
  0x2c   :  { %p634_p8 = por %p633_p7, %p632_p6 }
  0x2e   :  { %p635_p9 = pnand %p634_p8, %p628_p5 }
  0x30   :  { %638 = shalt.err (!%p635_p9)
}
  0x31   :  { %55 = dma.hbm_to_vmem [thread:$0]  %s795_s5, 1024, %s50_s28, [#allocation5], %s645_s13, %s645_s13, %s646_s14  }
  0x32   :  { %639 = dma.done.wait [#allocation3], 1024  }
  0x33   :  { %640 = vsyncadd [#allocation3], 4294966272 }
  0x34   :  { %641 = dma.done.wait [#allocation5], 2048  }
  0x35   :  { %642 = vsyncadd [#allocation5], 4294965248  ;;  %v648_v0 = vmov 0.0   ;;  %vm649_vm0 = vmmov 0   ;;  %v548_v1 = vld [vmem:[#allocation2] sm:$0xff]   ;;  %v549_v2 = vld [vmem:[#allocation2 + $0x8] sm:$0xff]  }
  0x36   :  { %481 = vmatprep.subr.bf16.mxu0 %v648_v0  ;;  %497 = vmatprep.mubr.msk.bf16.mxu0 %vm649_vm0, %v648_v0  ;;  %v550_v3 = vld [vmem:[#allocation2 + $0x10] sm:$0xff]   ;;  %v557_v4 = vld [vmem:[#allocation4] sm:$0xff]   ;;  %v551_v5 = vld [vmem:[#allocation2 + $0x18] sm:$0xff]  }
  0x37   :  { %501 = vmatprep.subr.bf16.mxu1 %v648_v0  ;;  %517 = vmatprep.mubr.msk.bf16.mxu1 %vm649_vm0, %v648_v0  ;;  %v558_v6 = vld [vmem:[#allocation4 + $0x8] sm:$0xff]   ;;  %v552_v7 = vld [vmem:[#allocation2 + $0x20] sm:$0xff]   ;;  %v559_v8 = vld [vmem:[#allocation4 + $0x10] sm:$0xff]  }
  0x38   :  { %482 = vmatpush3.bf16.msra.mxu0 %v548_v1  ;;  %502 = vmatpush3.bf16.msra.mxu1 %v557_v4  ;;  %v553_v9 = vld [vmem:[#allocation2 + $0x28] sm:$0xff]   ;;  %v560_v10 = vld [vmem:[#allocation4 + $0x18] sm:$0xff]   ;;  %v554_v11 = vld [vmem:[#allocation2 + $0x30] sm:$0xff]  }
  0x39   :  { %483 = vmatprep.subr.bf16.mxu0 %v648_v0  ;;  %503 = vmatprep.subr.bf16.mxu1 %v648_v0  ;;  %v561_v12 = vld [vmem:[#allocation4 + $0x20] sm:$0xff]   ;;  %v555_v13 = vld [vmem:[#allocation2 + $0x38] sm:$0xff]   ;;  %v562_v14 = vld [vmem:[#allocation4 + $0x28] sm:$0xff]  }
  0x3a   :  { %v556_v15 = vld [vmem:[%s790_s0] sm:$0xff]   ;;  %v563_v16 = vld [vmem:[#allocation4 + $0x30] sm:$0xff]   ;;  %v564_v17 = vld [vmem:[#allocation4 + $0x38] sm:$0xff]  }
  0x3b   :  { %v565_v18 = vld [vmem:[#allocation6] sm:$0xff]   ;;  %v566_v19 = vld [vmem:[#allocation6 + $0x8] sm:$0xff]   ;;  %v567_v20 = vld [vmem:[#allocation6 + $0x10] sm:$0xff]  }
  0x3c   :  { %484 = vmatpush3.bf16.msra.mxu0 %v549_v2  ;;  %504 = vmatpush3.bf16.msra.mxu1 %v558_v6  ;;  %v568_v21 = vld [vmem:[#allocation6 + $0x18] sm:$0xff]   ;;  %v569_v22 = vld [vmem:[#allocation6 + $0x20] sm:$0xff]   ;;  %v570_v23 = vld [vmem:[#allocation6 + $0x28] sm:$0xff]  }
  0x3d   :  { %485 = vmatprep.subr.bf16.mxu0 %v648_v0  ;;  %505 = vmatprep.subr.bf16.mxu1 %v648_v0  ;;  %v426_v24 = vld [vmem:[%s792_s2] ss:$0 sm:$0xff]  ;;  %v571_v34 = vld [vmem:[#allocation6 + $0x30] sm:$0xff]   ;;  %v572_v35 = vld [vmem:[#allocation6 + $0x38] sm:$0xff]  }
  0x3e   :  { %v436_v36 = vld [vmem:[%s794_s4] ss:$0 sm:$0xff] }
  0x3f   :  { %v445_v46 = vld [vmem:[%s796_s6] ss:$0 sm:$0xff] }
  0x40   :  { %486 = vmatpush3.bf16.msra.mxu0 %v550_v3  ;;  %506 = vmatpush3.bf16.msra.mxu1 %v559_v8 }
  0x41   :  { %487 = vmatprep.subr.bf16.mxu0 %v648_v0  ;;  %507 = vmatprep.subr.bf16.mxu1 %v648_v0 }
  0x44   :  { %488 = vmatpush3.bf16.msra.mxu0 %v551_v5  ;;  %508 = vmatpush3.bf16.msra.mxu1 %v560_v10 }
  0x45   :  { %489 = vmatprep.subr.bf16.mxu0 %v648_v0  ;;  %509 = vmatprep.subr.bf16.mxu1 %v648_v0 }
  0x48   :  { %490 = vmatpush3.bf16.msra.mxu0 %v552_v7  ;;  %510 = vmatpush3.bf16.msra.mxu1 %v561_v12 }
  0x49   :  { %491 = vmatprep.subr.bf16.mxu0 %v648_v0  ;;  %511 = vmatprep.subr.bf16.mxu1 %v648_v0 }
  0x4c   :  { %492 = vmatpush3.bf16.msra.mxu0 %v553_v9  ;;  %512 = vmatpush3.bf16.msra.mxu1 %v562_v14 }
  0x4d   :  { %493 = vmatprep.subr.bf16.mxu0 %v648_v0  ;;  %513 = vmatprep.subr.bf16.mxu1 %v648_v0 }
  0x50   :  { %494 = vmatpush3.bf16.msra.mxu0 %v554_v11  ;;  %514 = vmatpush3.bf16.msra.mxu1 %v563_v16 }
  0x51   :  { %495 = vmatprep.subr.bf16.mxu0 %v648_v0  ;;  %515 = vmatprep.subr.bf16.mxu1 %v648_v0 }
  0x54   :  { %496 = vmatpush3.bf16.msra.mxu0 %v555_v13  ;;  %516 = vmatpush3.bf16.msra.mxu1 %v564_v17 }
  0x55   :  { %521 = vmatprep.subr.bf16.mxu0 %v648_v0 }
  0x57   :  { %498 = vmatmul.mubr.bf16.vlgmr.msra.gmra.mrb[0].mxu0 %v556_v15 }
  0x58   :  { %537 = vmatprep.mubr.msk.bf16.mxu0 %vm649_vm0, %v648_v0  ;;  %522 = vmatpush3.bf16.msra.mxu0 %v565_v18 }
  0x59   :  { %523 = vmatprep.subr.bf16.mxu0 %v648_v0 }
  0x5c   :  { %524 = vmatpush3.bf16.msra.mxu0 %v566_v19 }
  0x5d   :  { %525 = vmatprep.subr.bf16.mxu0 %v648_v0 }
  0x60   :  { %526 = vmatpush3.bf16.msra.mxu0 %v567_v20 }
  0x61   :  { %527 = vmatprep.subr.bf16.mxu0 %v648_v0 }
  0x64   :  { %528 = vmatpush3.bf16.msra.mxu0 %v568_v21 }
  0x65   :  { %529 = vmatprep.subr.bf16.mxu0 %v648_v0 }
  0x68   :  { %530 = vmatpush3.bf16.msra.mxu0 %v569_v22 }
  0x69   :  { %531 = vmatprep.subr.bf16.mxu0 %v648_v0 }
  0x6c   :  { %532 = vmatpush3.bf16.msra.mxu0 %v570_v23 }
  0x6d   :  { %533 = vmatprep.subr.bf16.mxu0 %v648_v0 }
  0x70   :  { %534 = vmatpush3.bf16.msra.mxu0 %v571_v34 }
  0x71   :  { %535 = vmatprep.subr.bf16.mxu0 %v648_v0 }
  0x74   :  { %536 = vmatpush3.bf16.msra.mxu0 %v572_v35 }
 0x12a   :  { %v181_v25 = vpop.f32.mrb[0].mxu0 }
 0x12b   :  { %v182_v26 = vadd.f32 %v426_v24, %v181_v25  ;;  %v499_v27 = vpop.f32.mrb[1].mxu0 }
 0x12c   :  { %v184_v28 = vpop.f32.mrb[2].mxu0 }
 0x12d   :  { %v185_v29 = vadd.f32 %v426_v24, %v184_v28  ;;  %v500_v30 = vpop.f32.mrb[3].mxu0  ;;  %v188_v31 = vmax.f32 %v182_v26, 0.0 }
 0x12f   :  { %v189_v32 = vmax.f32 %v185_v29, 0.0 }
 0x131   :  { %v190_v33 = vpack.c.bf16 %v189_v32, %v188_v31 }
 0x133   :  { %518 = vmatmul.mubr.bf16.vlgmr.msra.gmra.mrb[0].mxu1 %v190_v33 }
 0x206   :  { %v296_v37 = vpop.f32.mrb[0].mxu1 }
 0x207   :  { %v297_v38 = vadd.f32 %v436_v36, %v296_v37  ;;  %v519_v39 = vpop.f32.mrb[1].mxu1 }
 0x208   :  { %v299_v40 = vpop.f32.mrb[2].mxu1 }
 0x209   :  { %v300_v41 = vadd.f32 %v436_v36, %v299_v40  ;;  %v520_v42 = vpop.f32.mrb[3].mxu1  ;;  %v303_v43 = vmax.f32 %v297_v38, 0.0 }
 0x20b   :  { %v304_v44 = vmax.f32 %v300_v41, 0.0 }
 0x20d   :  { %v305_v45 = vpack.c.bf16 %v304_v44, %v303_v43 }
 0x20f   :  { %538 = vmatmul.mubr.bf16.vlgmr.msra.gmra.mrb[4].mxu0 %v305_v45 }
 0x2e2   :  { %v411_v47 = vpop.f32.mrb[4].mxu0 }
 0x2e3   :  { %v412_v48 = vadd.f32 %v445_v46, %v411_v47  ;;  %v539_v49 = vpop.f32.mrb[5].mxu0 }
 0x2e4   :  { %v414_v50 = vpop.f32.mrb[6].mxu0 }
 0x2e5   :  { %418 = vst [vmem:[%s797_s7] sm:$0xff] %v412_v48  ;;  %v415_v51 = vadd.f32 %v445_v46, %v414_v50  ;;  %v540_v52 = vpop.f32.mrb[7].mxu0 }
 0x2e7   :  { %419 = vst [vmem:[%s797_s7 + $0x8] sm:$0xff] %v415_v51 }
 0x2e8   :  { %424 = vsyncpa [#allocation3], 1 }
 0x2e9   :  { %425 = vsyncpa [#allocation5], 1 }

</bundles_post_ra>
